<compile_context>
chip_gen: v6e
topology: v6e:2x2x1
jax: 0.10.0
libtpu: 0.0.40
codegen_flags: <defaults>
</compile_context>

<pallas_src>
import jax
import jax.numpy as jnp
from jax.experimental import pallas as pl
from jax.experimental.pallas import tpu as pltpu

_LANE = 128
_SUBLANE = 8
_MIB = 1024 * 1024


def _round_up(x, m):
    return ((x + m - 1) // m) * m


def _pad_cast(a, rows, cols, dtype):
    """Cast + zero-pad a 2-D array to (rows, cols).  Both steps are skipped
    when the array already has the target dtype / shape, so pre-prepared
    parameters incur zero extra HBM traffic per call."""
    a = jnp.asarray(a)
    if a.dtype != dtype:
        a = a.astype(dtype)
    if a.shape != (rows, cols):
        a = jnp.pad(a, ((0, rows - a.shape[0]), (0, cols - a.shape[1])))
    return a


def prepare_inv_embeddings(inv_embeddings, *, tn=512, mxu_dtype=jnp.bfloat16):
    """One-time pad + cast of the (embed, output) vocab table.  Pass the result
    (together with output_size=) to tied_softmax so the full table is never
    re-padded / re-cast inside the per-call wrapper."""
    embed, output = inv_embeddings.shape
    emb_p = _round_up(embed, _LANE)
    tn_eff = _round_up(min(tn, _round_up(output, _LANE)), _LANE)
    out_p = _round_up(output, tn_eff)
    return _pad_cast(inv_embeddings, emb_p, out_p, mxu_dtype)


# --------------------------------------------------------------------------- #
# Kernels
# --------------------------------------------------------------------------- #
def _tied_softmax_fused_kernel(x_ref, w1_ref, b1_ref, w2_ref, b2_ref,
                               inv_emb_ref, out_ref, q_ref):
    # x_ref:       (tm, hid_p)    bf16
    # w1_ref:      (hid_p, hid_p) bf16    b1_ref: (1, hid_p) f32
    # w2_ref:      (hid_p, emb_p) bf16    b2_ref: (1, emb_p) f32
    # inv_emb_ref: (emb_p, tn)    bf16
    # out_ref:     (tm, tn)
    # q_ref:       (tm, emb_p)    bf16 scratch, persists across vocab tiles
    #
    # CORRECTNESS INVARIANT: grid axis 1 (vocab) must stay "arbitrary"
    # (sequential per core, starting at j == 0, j innermost).  Marking it
    # "parallel" or reordering the grid would read q_ref uninitialized.
    @pl.when(pl.program_id(1) == 0)
    def _():
        h = jnp.dot(x_ref[...], w1_ref[...],
                    preferred_element_type=jnp.float32) + b1_ref[...]
        h = jnp.tanh(h)                                       # f32 elementwise
        q = jnp.dot(h.astype(w2_ref.dtype), w2_ref[...],
                    preferred_element_type=jnp.float32) + b2_ref[...]
        q_ref[...] = q.astype(q_ref.dtype)                    # single bf16 cast

    out_ref[...] = jnp.dot(q_ref[...], inv_emb_ref[...],
                           preferred_element_type=jnp.float32
                           ).astype(out_ref.dtype)


def _project_kernel(x_ref, w1_ref, b1_ref, w2_ref, b2_ref, q_ref):
    # q = Linear2(tanh(Linear1(x))) for one row tile; bf16 output.
    h = jnp.dot(x_ref[...], w1_ref[...],
                preferred_element_type=jnp.float32) + b1_ref[...]
    h = jnp.tanh(h)
    q = jnp.dot(h.astype(w2_ref.dtype), w2_ref[...],
                preferred_element_type=jnp.float32) + b2_ref[...]
    q_ref[...] = q.astype(q_ref.dtype)


def _logits_matmul_kernel(q_ref, inv_emb_ref, out_ref):
    out_ref[...] = jnp.dot(q_ref[...], inv_emb_ref[...],
                           preferred_element_type=jnp.float32
                           ).astype(out_ref.dtype)


# --------------------------------------------------------------------------- #
# Wrapper
# --------------------------------------------------------------------------- #
def tied_softmax(x, w1, b1, w2, b2, inv_embeddings, *, output_size=None,
                 tm=512, tn=512, mxu_dtype=jnp.bfloat16,
                 out_dtype=jnp.float32, fuse_projection=None):
    """x: (..., hidden).  w1:(hidden,hidden), b1:(1,hidden), w2:(hidden,embed),
    b2:(1,embed), inv_embeddings:(embed, output) (may be pre-padded / bf16 via
    prepare_inv_embeddings, in which case pass output_size).  Returns
    (..., output) in out_dtype."""
    hidden = x.shape[-1]
    embed = w2.shape[1]                    # logical embed (inv table may be padded)
    if output_size is None:
        output_size = inv_embeddings.shape[1]
    lead = x.shape[:-1]

    x2 = x.reshape(-1, hidden)
    M = x2.shape[0]

    hid_p = _round_up(hidden, _LANE)
    emb_p = _round_up(embed, _LANE)

    tm_eff = _round_up(min(tm, _round_up(M, _SUBLANE)), _SUBLANE)
    M_p = _round_up(M, tm_eff)
    tn_eff = _round_up(min(tn, _round_up(output_size, _LANE)), _LANE)

    # Skip padding/casting the vocab table entirely when it is already prepared.
    if (inv_embeddings.dtype == mxu_dtype
            and inv_embeddings.shape[0] == emb_p
            and inv_embeddings.shape[1] >= output_size
            and inv_embeddings.shape[1] % tn_eff == 0):
        inv_p = inv_embeddings
        out_p = inv_embeddings.shape[1]
    else:
        out_p = _round_up(max(output_size, inv_embeddings.shape[1]), tn_eff)
        inv_p = _pad_cast(inv_embeddings, emb_p, out_p, mxu_dtype)

    n_row_tiles = M_p // tm_eff
    n_vocab_tiles = out_p // tn_eff

    out_bytes = jnp.dtype(out_dtype).itemsize
    x_p = _pad_cast(x2, M_p, hid_p, mxu_dtype)         # direct bf16 cast (no f32 round trip)
    w1_p = _pad_cast(w1, hid_p, hid_p, mxu_dtype)
    w2_p = _pad_cast(w2, hid_p, emb_p, mxu_dtype)
    b1_p = _pad_cast(b1, 1, hid_p, jnp.float32)        # bias adds stay f32
    b2_p = _pad_cast(b2, 1, emb_p, jnp.float32)

    if fuse_projection is None:
        # Decode-shaped inputs (a single row tile): split the projection out so
        # both axes of the big logits matmul can be "parallel" (v7x: 2 TCs).
        fuse_projection = n_row_tiles >= 2

    single = dict(pipeline_mode=pl.Buffered(1))        # grid-invariant operands

    if fuse_projection:
        need = (2 * tm_eff * hid_p * 2                 # x tile (double-buffered)
                + hid_p * hid_p * 2                    # W1 (single-buffered)
                + hid_p * emb_p * 2                    # W2 (single-buffered)
                + (hid_p + emb_p) * 4                  # biases
                + 2 * emb_p * tn_eff * 2               # inv_emb tile
                + 2 * tm_eff * tn_eff * out_bytes      # out tile
                + tm_eff * emb_p * 2)                  # bf16 q scratch
        vmem_limit = int(min(max(2 * need, 16 * _MIB), 40 * _MIB))

        cost = pl.CostEstimate(
            flops=int(2 * M_p * (hid_p * hid_p + hid_p * emb_p)
                      + 2 * M_p * emb_p * out_p),
            transcendentals=int(M_p * hid_p),
            bytes_accessed=int(M_p * hid_p * 2 + hid_p * (hid_p + emb_p) * 2
                               + n_row_tiles * emb_p * out_p * 2
                               + M_p * out_p * out_bytes))

        out = pl.pallas_call(
            _tied_softmax_fused_kernel,
            out_shape=jax.ShapeDtypeStruct((M_p, out_p), out_dtype),
            grid=(n_row_tiles, n_vocab_tiles),
            in_specs=[
                pl.BlockSpec((tm_eff, hid_p), lambda i, j: (i, 0)),            # x rows
                pl.BlockSpec((hid_p, hid_p), lambda i, j: (0, 0), **single),   # W1
                pl.BlockSpec((1, hid_p), lambda i, j: (0, 0), **single),       # b1
                pl.BlockSpec((hid_p, emb_p), lambda i, j: (0, 0), **single),   # W2
                pl.BlockSpec((1, emb_p), lambda i, j: (0, 0), **single),       # b2
                pl.BlockSpec((emb_p, tn_eff), lambda i, j: (0, j)),            # inv tile
            ],
            out_specs=pl.BlockSpec((tm_eff, tn_eff), lambda i, j: (i, j)),
            scratch_shapes=[pltpu.VMEM((tm_eff, emb_p), mxu_dtype)],           # bf16 q
            compiler_params=pltpu.CompilerParams(
                dimension_semantics=("parallel", "arbitrary"),
                vmem_limit_bytes=vmem_limit,
            ),
            cost_estimate=cost,
        )(x_p, w1_p, b1_p, w2_p, b2_p, inv_p)
    else:
        # ---- split path: tiny projection kernel, then a pure tiled matmul ----
        proj_need = (2 * tm_eff * hid_p * 2 + hid_p * hid_p * 2
                     + hid_p * emb_p * 2 + (hid_p + emb_p) * 4
                     + 2 * tm_eff * emb_p * 2)
        q_p = pl.pallas_call(
            _project_kernel,
            out_shape=jax.ShapeDtypeStruct((M_p, emb_p), mxu_dtype),
            grid=(n_row_tiles,),
            in_specs=[
                pl.BlockSpec((tm_eff, hid_p), lambda i: (i, 0)),
                pl.BlockSpec((hid_p, hid_p), lambda i: (0, 0), **single),
                pl.BlockSpec((1, hid_p), lambda i: (0, 0), **single),
                pl.BlockSpec((hid_p, emb_p), lambda i: (0, 0), **single),
                pl.BlockSpec((1, emb_p), lambda i: (0, 0), **single),
            ],
            out_specs=pl.BlockSpec((tm_eff, emb_p), lambda i: (i, 0)),
            compiler_params=pltpu.CompilerParams(
                dimension_semantics=("parallel",),
                vmem_limit_bytes=int(min(max(2 * proj_need, 16 * _MIB),
                                         40 * _MIB)),
            ),
            cost_estimate=pl.CostEstimate(
                flops=int(2 * M_p * (hid_p * hid_p + hid_p * emb_p)),
                transcendentals=int(M_p * hid_p),
                bytes_accessed=int(M_p * hid_p * 2 + hid_p * (hid_p + emb_p) * 2
                                   + M_p * emb_p * 2)),
        )(x_p, w1_p, b1_p, w2_p, b2_p)

        mm_need = (2 * tm_eff * emb_p * 2 + 2 * emb_p * tn_eff * 2
                   + 2 * tm_eff * tn_eff * out_bytes)
        out = pl.pallas_call(
            _logits_matmul_kernel,
            out_shape=jax.ShapeDtypeStruct((M_p, out_p), out_dtype),
            grid=(n_row_tiles, n_vocab_tiles),
            in_specs=[
                pl.BlockSpec((tm_eff, emb_p), lambda i, j: (i, 0)),
                pl.BlockSpec((emb_p, tn_eff), lambda i, j: (0, j)),
            ],
            out_specs=pl.BlockSpec((tm_eff, tn_eff), lambda i, j: (i, j)),
            compiler_params=pltpu.CompilerParams(
                # Both axes parallel: vocab dim can be sharded across v7x TCs.
                dimension_semantics=("parallel", "parallel"),
                vmem_limit_bytes=int(min(max(2 * mm_need, 16 * _MIB),
                                         40 * _MIB)),
            ),
            cost_estimate=pl.CostEstimate(
                flops=int(2 * M_p * emb_p * out_p),
                transcendentals=0,
                bytes_accessed=int(M_p * emb_p * 2 + emb_p * out_p * 2
                                   + M_p * out_p * out_bytes)),
        )(q_p, inv_p)

    return out[:M, :output_size].reshape(*lead, output_size)


def reference(x, w1, b1, w2, b2, inv_embeddings):
    h = jnp.tanh(x @ w1 + b1[0])
    q = h @ w2 + b2[0]
    return q @ inv_embeddings


if __name__ == "__main__":
    # Small shapes consistent with the module.
    batch, seq = 2, 8
    hidden_size = 32
    embed_size = 32
    output_size = 384   # vocabulary size of the tied embedding table

    key = jax.random.PRNGKey(0)
    k_emb, k_x, k_w1, k_b1, k_w2, k_b2 = jax.random.split(key, 6)

    # "embeddings" is (output_size, embed_size); inv_embeddings = embeddings.T
    embeddings = jax.random.normal(k_emb, (output_size, embed_size), jnp.float32) * 0.1
    inv_embeddings = embeddings.T                     # (embed_size, output_size)

    # PyTorch Linear stores W as (out, in); we pre-transpose to (in, out).
    w1 = jax.random.normal(k_w1, (hidden_size, hidden_size), jnp.float32) * 0.1
    b1 = jax.random.normal(k_b1, (1, hidden_size), jnp.float32) * 0.1
    w2 = jax.random.normal(k_w2, (hidden_size, embed_size), jnp.float32) * 0.1
    b2 = jax.random.normal(k_b2, (1, embed_size), jnp.float32) * 0.1

    x = jax.random.normal(k_x, (batch, seq, hidden_size), jnp.float32)

    # One-time pad + bf16 cast of the vocab table (never re-padded per call).
    inv_prepped = prepare_inv_embeddings(inv_embeddings, tn=512)

    ref = reference(x.reshape(-1, hidden_size), w1, b1, w2, b2, inv_embeddings)
    ref = ref.reshape(batch, seq, output_size)

    # Path 1 (auto): decode-shaped (single row tile) -> split projection kernel
    # + pure logits matmul with both grid axes parallel.
    logits_split = tied_softmax(x, w1, b1, w2, b2, inv_prepped,
                                output_size=output_size)
    jax.block_until_ready(logits_split)
    assert logits_split.shape == (batch, seq, output_size)
    # bf16 MXU operands (f32 accumulation) -> loosened tolerance vs f32 reference.
    assert jnp.allclose(logits_split, ref, atol=2e-2, rtol=2e-2), float(
        jnp.max(jnp.abs(logits_split - ref)))

    # Path 2 (forced fused): bf16 q cached in VMEM scratch, reused across
    # multiple streamed vocab tiles (tn=128 -> 3 vocab tiles).
    logits_fused = tied_softmax(x, w1, b1, w2, b2, inv_prepped,
                                output_size=output_size, tn=128,
                                fuse_projection=True)
    jax.block_until_ready(logits_fused)
    assert logits_fused.shape == (batch, seq, output_size)
    assert jnp.allclose(logits_fused, ref, atol=2e-2, rtol=2e-2), float(
        jnp.max(jnp.abs(logits_fused - ref)))

    print("KERNEL_OK")
</pallas_src>

<mosaic_0001>
module attributes {stable_mosaic.version = 11 : i64} {
  func.func @_project_kernel(%arg0: i32, %arg1: memref<16x128xbf16, #tpu.memory_space<vmem>>, %arg2: memref<128x128xbf16, #tpu.memory_space<vmem>>, %arg3: memref<1x128xf32, #tpu.memory_space<vmem>>, %arg4: memref<128x128xbf16, #tpu.memory_space<vmem>>, %arg5: memref<1x128xf32, #tpu.memory_space<vmem>>, %arg6: memref<16x128xbf16, #tpu.memory_space<vmem>>) attributes {dimension_semantics = [#tpu.dimension_semantics<parallel>], iteration_bounds = array<i64: 1>, scalar_prefetch = 0 : i64, scratch_operands = 0 : i64, tpu.core_type = #tpu.core_type<tc>, window_params = [{transform_indices = @transform_0, window_bounds = array<i64: 16, 128>}, {pipeline_mode = #tpu.pipeline_mode<synchronous>, transform_indices = @transform_1, window_bounds = array<i64: 128, 128>}, {pipeline_mode = #tpu.pipeline_mode<synchronous>, transform_indices = @transform_2, window_bounds = array<i64: 1, 128>}, {pipeline_mode = #tpu.pipeline_mode<synchronous>, transform_indices = @transform_3, window_bounds = array<i64: 128, 128>}, {pipeline_mode = #tpu.pipeline_mode<synchronous>, transform_indices = @transform_4, window_bounds = array<i64: 1, 128>}, {transform_indices = @transform_5, window_bounds = array<i64: 16, 128>}]} {
    %c0 = arith.constant 0 : index
    %c0_0 = arith.constant 0 : index
    %0 = vector.load %arg1[%c0, %c0_0] : memref<16x128xbf16, #tpu.memory_space<vmem>>, vector<16x128xbf16>
    %c0_1 = arith.constant 0 : index
    %c0_2 = arith.constant 0 : index
    %1 = vector.load %arg2[%c0_1, %c0_2] : memref<128x128xbf16, #tpu.memory_space<vmem>>, vector<128x128xbf16>
    %cst = arith.constant dense<0.000000e+00> : vector<16x128xf32>
    %2 = tpu.matmul %0, %1, %cst {dimension_numbers = #tpu.dot_dimension_numbers<[1], [0], [0], [1], [0, 0, 1, 1], [], []>} : vector<16x128xbf16>, vector<128x128xbf16>, vector<16x128xf32> -> vector<16x128xf32>
    %c0_3 = arith.constant 0 : index
    %c0_4 = arith.constant 0 : index
    %3 = vector.load %arg3[%c0_3, %c0_4] : memref<1x128xf32, #tpu.memory_space<vmem>>, vector<1x128xf32>
    %4 = vector.broadcast %3 : vector<1x128xf32> to vector<16x128xf32>
    %5 = arith.addf %2, %4 : vector<16x128xf32>
    %6 = math.tanh %5 : vector<16x128xf32>
    %7 = arith.truncf %6 : vector<16x128xf32> to vector<16x128xbf16>
    %c0_5 = arith.constant 0 : index
    %c0_6 = arith.constant 0 : index
    %8 = vector.load %arg4[%c0_5, %c0_6] : memref<128x128xbf16, #tpu.memory_space<vmem>>, vector<128x128xbf16>
    %cst_7 = arith.constant dense<0.000000e+00> : vector<16x128xf32>
    %9 = tpu.matmul %7, %8, %cst_7 {dimension_numbers = #tpu.dot_dimension_numbers<[1], [0], [0], [1], [0, 0, 1, 1], [], []>} : vector<16x128xbf16>, vector<128x128xbf16>, vector<16x128xf32> -> vector<16x128xf32>
    %c0_8 = arith.constant 0 : index
    %c0_9 = arith.constant 0 : index
    %10 = vector.load %arg5[%c0_8, %c0_9] : memref<1x128xf32, #tpu.memory_space<vmem>>, vector<1x128xf32>
    %11 = vector.broadcast %10 : vector<1x128xf32> to vector<16x128xf32>
    %12 = arith.addf %9, %11 : vector<16x128xf32>
    %13 = arith.truncf %12 : vector<16x128xf32> to vector<16x128xbf16>
    %c0_10 = arith.constant 0 : index
    %c0_11 = arith.constant 0 : index
    %14 = vector.load %arg6[%c0_10, %c0_11] : memref<16x128xbf16, #tpu.memory_space<vmem>>, vector<16x128xbf16>
    tpu.vector_store %arg6[%c0_10, %c0_11], %13 {strides = array<i32>} : memref<16x128xbf16, #tpu.memory_space<vmem>>, vector<16x128xbf16>,
    return
  }
  func.func @transform_0(%arg0: i32) -> (i32, i32) {
    %c0_i32 = arith.constant 0 : i32
    %c0_i32_0 = arith.constant 0 : i32
    return %arg0, %c0_i32 : i32, i32
  }
  func.func @transform_1(%arg0: i32) -> (i32, i32) {
    %c0_i32 = arith.constant 0 : i32
    %c0_i32_0 = arith.constant 0 : i32
    %c0_i32_1 = arith.constant 0 : i32
    return %c0_i32, %c0_i32_0 : i32, i32
  }
  func.func @transform_2(%arg0: i32) -> (i32, i32) {
    %c0_i32 = arith.constant 0 : i32
    %c0_i32_0 = arith.constant 0 : i32
    %c0_i32_1 = arith.constant 0 : i32
    return %c0_i32, %c0_i32_0 : i32, i32
  }
  func.func @transform_3(%arg0: i32) -> (i32, i32) {
    %c0_i32 = arith.constant 0 : i32
    %c0_i32_0 = arith.constant 0 : i32
    %c0_i32_1 = arith.constant 0 : i32
    return %c0_i32, %c0_i32_0 : i32, i32
  }
  func.func @transform_4(%arg0: i32) -> (i32, i32) {
    %c0_i32 = arith.constant 0 : i32
    %c0_i32_0 = arith.constant 0 : i32
    %c0_i32_1 = arith.constant 0 : i32
    return %c0_i32, %c0_i32_0 : i32, i32
  }
  func.func @transform_5(%arg0: i32) -> (i32, i32) {
    %c0_i32 = arith.constant 0 : i32
    %c0_i32_0 = arith.constant 0 : i32
    return %arg0, %c0_i32 : i32, i32
  }
}

</mosaic_0001>

<bundles_post_ra>
// kernel: tpu_custom_call.1
= control target key start
LH: loop header
LB: loop body
LE: loop exit
PB: predicated region body
PF: predicated region fallthrough
CT: control target
= control target key end

     0   :  { %10 = vsyncpa [#allocation3], 0  ;;  %s595_s0 = inlined_call_operand.hbm [shape: bf16[16,128], index: 0, kind: input, shape index: {}]   ;;  %s596_s1 = inlined_call_operand.hbm [shape: bf16[128,128], index: 1, kind: input, shape index: {}]   ;;  %s597_s2 = inlined_call_operand.vmem [shape: f32[1,128], index: 2, kind: input, shape index: {}]   ;;  %s598_s3 = inlined_call_operand.hbm [shape: bf16[128,128], index: 3, kind: input, shape index: {}]   ;;  %s599_s4 = inlined_call_operand.vmem [shape: f32[1,128], index: 4, kind: input, shape index: {}]   ;;  %s600_s5 = inlined_call_operand.hbm [shape: bf16[16,128], index: 5, kind: output, shape index: {}]  }
   0x1   :  { %11 = vsyncpa [#allocation6], 0 }
   0x2   :  { %12 = vsyncpa [#allocation4], 0  ;;  %s527_s18 = smov [#allocation5]   ;;  %s528_s20 = smov [#allocation2]  }
   0x3   :  { %s30_s19 = sshll.u32 %s527_s18, 4  ;;  %s18_s21 = sshll.u32 %s528_s20, 4  ;;  %s31_s19 = int_to_ptr.vmem [resolvable:$true] %s30_s19  ;;  %s19_s21 = int_to_ptr.vmem [resolvable:$true] %s18_s21 }
   0x4   :  { %s449_s22 = scalar_lea.vmem %s31_s19, 1024  ;;  %p454_p1 = scmp.lt.s32.totalorder %s31_s19, %s31_s19 }
   0x5   :  { %p450_p0 = scmp.ne.s32.totalorder %s31_s19, %s449_s22  ;;  %p455_p2 = scmp.lt.s32.totalorder %s449_s22, %s449_s22 }
   0x7   :  { %p456_p3 = por %p455_p2, %p454_p1 }
   0x9   :  { %p457_p4 = pnand %p456_p3, %p450_p0 }
   0xb   :  { %460 = shalt.err (!%p457_p4)
}
   0xc   :  { %s529_s23 = smov 64   ;;  %s530_s24 = smov 4  }
   0xd   :  { %36 = dma.hbm_to_vmem [thread:$0]  %s596_s1, 1024, %s31_s19, [#allocation6], %s529_s23, %s529_s23, %s530_s24  }
   0xe   :  { %s469_s27 = scalar_lea.vmem %s19_s21, 128  ;;  %p474_p6 = scmp.lt.s32.totalorder %s19_s21, %s19_s21 }
   0xf   :  { %p470_p5 = scmp.ne.s32.totalorder %s19_s21, %s469_s27  ;;  %p475_p7 = scmp.lt.s32.totalorder %s469_s27, %s469_s27 }
  0x11   :  { %p476_p8 = por %p475_p7, %p474_p6 }
  0x13   :  { %p477_p9 = pnand %p476_p8, %p470_p5 }
  0x15   :  { %480 = shalt.err (!%p477_p9)
}
  0x16   :  { %24 = dma.hbm_to_vmem [thread:$0]  %s595_s0, 128, %s19_s21, [#allocation3], %s529_s23, %s529_s23, %s530_s24  }
  0x17   :  { %s531_s30 = smov [#allocation7]  }
  0x18   :  { %s44_s6 = sshll.u32 %s531_s30, 4  ;;  %s45_s6 = int_to_ptr.vmem [resolvable:$true] %s44_s6 }
  0x19   :  { %s489_s7 = scalar_lea.vmem %s45_s6, 1024  ;;  %p494_p11 = scmp.lt.s32.totalorder %s45_s6, %s45_s6 }
  0x1a   :  { %p490_p10 = scmp.ne.s32.totalorder %s45_s6, %s489_s7  ;;  %p495_p12 = scmp.lt.s32.totalorder %s489_s7, %s489_s7 }
  0x1c   :  { %p496_p13 = por %p495_p12, %p494_p11 }
  0x1e   :  { %p497_p0 = pnand %p496_p13, %p490_p10 }
  0x20   :  { %500 = shalt.err (!%p497_p0)
}
  0x21   :  { %50 = dma.hbm_to_vmem [thread:$0]  %s598_s3, 1024, %s45_s6, [#allocation6], %s529_s23, %s529_s23, %s530_s24  }
  0x22   :  { %521 = dma.done.wait [#allocation3], 128  }
  0x23   :  { %522 = vsyncadd [#allocation3], 4294967168 }
  0x24   :  { %523 = dma.done.wait [#allocation6], 2048  }
  0x25   :  { %524 = vsyncadd [#allocation6], 4294965248  ;;  %v532_v0 = vmov 0.0   ;;  %vm533_vm0 = vmmov 0   ;;  %v420_v1 = vld [vmem:[#allocation5 + $0x38] sm:$0xff]   ;;  %v421_v2 = vld [vmem:[#allocation5 + $0x30] sm:$0xff]  }
  0x26   :  { %372 = vmatprep.subr.bf16.mxu0 %v532_v0  ;;  %388 = vmatprep.mubr.msk.bf16.mxu0 %vm533_vm0, %v532_v0  ;;  %v422_v3 = vld [vmem:[#allocation5 + $0x28] sm:$0xff]   ;;  %v429_v4 = vld [vmem:[#allocation7 + $0x38] sm:$0xff]   ;;  %v423_v5 = vld [vmem:[#allocation5 + $0x20] sm:$0xff]  }
  0x27   :  { %392 = vmatprep.subr.bf16.mxu1 %v532_v0  ;;  %408 = vmatprep.mubr.msk.bf16.mxu1 %vm533_vm0, %v532_v0  ;;  %v430_v6 = vld [vmem:[#allocation7 + $0x30] sm:$0xff]   ;;  %v424_v7 = vld [vmem:[#allocation5 + $0x18] sm:$0xff]   ;;  %v426_v9 = vld [vmem:[#allocation5 + $0x8] sm:$0xff]  }
  0x28   :  { %373 = vmatpush3.bf16.msra.mxu0 %v420_v1  ;;  %393 = vmatpush3.bf16.msra.mxu1 %v429_v4  ;;  %v425_v8 = vld [vmem:[#allocation5 + $0x10] sm:$0xff]   ;;  %v427_v10 = vld [vmem:[#allocation5] sm:$0xff]   ;;  %v428_v11 = vld [vmem:[#allocation2] sm:$0xff]  }
  0x29   :  { %374 = vmatprep.subr.bf16.mxu0 %v532_v0  ;;  %394 = vmatprep.subr.bf16.mxu1 %v532_v0  ;;  %v431_v12 = vld [vmem:[#allocation7 + $0x28] sm:$0xff]   ;;  %v432_v13 = vld [vmem:[#allocation7 + $0x20] sm:$0xff]   ;;  %v433_v14 = vld [vmem:[#allocation7 + $0x18] sm:$0xff]  }
  0x2a   :  { %v434_v15 = vld [vmem:[#allocation7 + $0x10] sm:$0xff]   ;;  %v435_v16 = vld [vmem:[#allocation7 + $0x8] sm:$0xff]   ;;  %v436_v17 = vld [vmem:[#allocation7] sm:$0xff]  }
  0x2b   :  { %v326_v18 = vld [vmem:[%s597_s2] ss:$0 sm:$0xff]  ;;  %s534_s2 = smov [#allocation8]  }
  0x2c   :  { %375 = vmatpush3.bf16.msra.mxu0 %v421_v2  ;;  %395 = vmatpush3.bf16.msra.mxu1 %v430_v6  ;;  %v336_v29 = vld [vmem:[%s599_s4] ss:$0 sm:$0xff]  ;;  %s313_s11 = sshll.u32 %s534_s2, 4  ;;  %s314_s11 = int_to_ptr.vmem [resolvable:$true] %s313_s11 }
  0x2d   :  { %376 = vmatprep.subr.bf16.mxu0 %v532_v0  ;;  %396 = vmatprep.subr.bf16.mxu1 %v532_v0  ;;  %s501_s12 = scalar_lea.vmem %s314_s11, 128  ;;  %p506_p2 = scmp.lt.s32.totalorder %s314_s11, %s314_s11 }
  0x2e   :  { %p502_p1 = scmp.ne.s32.totalorder %s314_s11, %s501_s12  ;;  %p507_p3 = scmp.lt.s32.totalorder %s501_s12, %s501_s12 }
  0x30   :  { %377 = vmatpush3.bf16.msra.mxu0 %v422_v3  ;;  %397 = vmatpush3.bf16.msra.mxu1 %v431_v12  ;;  %p508_p4 = por %p507_p3, %p506_p2 }
  0x31   :  { %378 = vmatprep.subr.bf16.mxu0 %v532_v0  ;;  %398 = vmatprep.subr.bf16.mxu1 %v532_v0 }
  0x32   :  { %p509_p5 = pnand %p508_p4, %p502_p1 }
  0x34   :  { %379 = vmatpush3.bf16.msra.mxu0 %v423_v5  ;;  %399 = vmatpush3.bf16.msra.mxu1 %v432_v13 }
  0x35   :  { %380 = vmatprep.subr.bf16.mxu0 %v532_v0  ;;  %400 = vmatprep.subr.bf16.mxu1 %v532_v0 }
  0x38   :  { %381 = vmatpush3.bf16.msra.mxu0 %v424_v7  ;;  %401 = vmatpush3.bf16.msra.mxu1 %v433_v14 }
  0x39   :  { %382 = vmatprep.subr.bf16.mxu0 %v532_v0  ;;  %402 = vmatprep.subr.bf16.mxu1 %v532_v0 }
  0x3c   :  { %383 = vmatpush3.bf16.msra.mxu0 %v425_v8  ;;  %403 = vmatpush3.bf16.msra.mxu1 %v434_v15 }
  0x3d   :  { %384 = vmatprep.subr.bf16.mxu0 %v532_v0  ;;  %404 = vmatprep.subr.bf16.mxu1 %v532_v0 }
  0x40   :  { %385 = vmatpush3.bf16.msra.mxu0 %v426_v9  ;;  %405 = vmatpush3.bf16.msra.mxu1 %v435_v16 }
  0x41   :  { %386 = vmatprep.subr.bf16.mxu0 %v532_v0  ;;  %406 = vmatprep.subr.bf16.mxu1 %v532_v0 }
  0x44   :  { %387 = vmatpush3.bf16.msra.mxu0 %v427_v10  ;;  %407 = vmatpush3.bf16.msra.mxu1 %v436_v17 }
  0x47   :  { %389 = vmatmul.mubr.bf16.vlgmr.msra.gmra.mxu0 %v428_v11 }
 0x107   :  { %v176_v19 = vpop.f32.mrf.mxu0 }
 0x108   :  { %v177_v20 = vadd.f32 %v326_v18, %v176_v19 }
 0x109   :  { %v390_v21 = vpop.f32.mrf.mxu0 }
 0x10a   :  { %437 = vtanh.f32 %v177_v20 }
 0x10b   :  { %v179_v22 = vpop.f32.mrf.mxu0 }
 0x10c   :  { %v180_v23 = vadd.f32 %v326_v18, %v179_v22 }
 0x10d   :  { %v391_v24 = vpop.f32.mrf.mxu0 }
 0x10e   :  { %439 = vtanh.f32 %v180_v23 }
 0x117   :  { %v438_v25 = vpop.eup %437 }
 0x11b   :  { %v440_v26 = vpop.eup %439 }
 0x11c   :  { %v185_v27 = vpack.c.bf16 %v440_v26, %v438_v25 }
 0x11e   :  { %409 = vmatmul.mubr.bf16.vlgmr.msra.gmra.mxu1 %v185_v27 }
 0x1de   :  { %v291_v28 = vpop.f32.mrf.mxu1 }
 0x1df   :  { %v292_v32 = vadd.f32 %v336_v29, %v291_v28 }
 0x1e0   :  { %v410_v30 = vpop.f32.mrf.mxu1 }
 0x1e2   :  { %v294_v31 = vpop.f32.mrf.mxu1 }
 0x1e3   :  { %v295_v33 = vadd.f32 %v336_v29, %v294_v31 }
 0x1e4   :  { %v411_v34 = vpop.f32.mrf.mxu1 }
 0x1e5   :  { %v352_v35 = vpack.c.bf16 %v295_v33, %v292_v32 }
 0x1e7   :  { %353 = vst [vmem:[#allocation8] sm:$0xff] %v352_v35  }
 0x1e8   :  { %512 = shalt.err (!%p509_p5)
}
 0x1e9   :  { %319 = dma.vmem_to_hbm [thread:$0]  %s314_s11, 128, %s600_s5, [#allocation4], %s529_s23, %s529_s23, %s530_s24  }
 0x1ea   :  { %525 = dma.done.wait [#allocation4], 128  }
 0x1eb   :  { %526 = vsyncadd [#allocation4], 4294967168 }
 0x1ec   :  { %323 = vsyncpa [#allocation3], 1 }
 0x1ed   :  { %324 = vsyncpa [#allocation6], 1 }
 0x1ee   :  { %325 = vsyncpa [#allocation4], 1 }

</bundles_post_ra>
